<compile_context>
chip_gen: v7x
topology: tpu7x:2x2x1
jax: 0.10.0
libtpu: 0.0.40
codegen_flags: <defaults>
</compile_context>

<pallas_src>
import jax
import jax.numpy as jnp
from jax.experimental import pallas as pl
from jax.experimental.pallas import tpu as pltpu


def _round_up(a, b):
    return (a + b - 1) // b * b


def _encoder_kernel(z_ref, x_ref, ftab_ref, w_x_ref, b_ref, out_ref):
    z = z_ref[...]                                   # (TILE_N, K) int32
    tn, k = z.shape
    v_pad = ftab_ref.shape[0]                        # 1024 (padded vocab)

    # Accumulator starts from the raw-feature projection + bias (no zeros pass).
    out = jnp.dot(x_ref[...], w_x_ref[...],
                  preferred_element_type=jnp.float32)
    out = out + b_ref[...]                           # (1, H_pad) broadcast

    # Per-slot one-hot built directly in bf16 and matmul-accumulated: the MXU
    # consumes it as it is produced; no (TILE_N, V) f32 intermediate lives in
    # VMEM and no separate cast pass is needed.
    iota_v = jax.lax.broadcasted_iota(jnp.int32, (tn, v_pad), 1)
    for kk in range(k):                              # K is small & static
        onehot = (iota_v == z[:, kk:kk + 1]).astype(jnp.bfloat16)
        out = out + jnp.dot(onehot, ftab_ref[...],
                            preferred_element_type=jnp.float32)

    out_ref[...] = out


def qm9_input_encoder(z, x, emb_table, weight, bias, *, tile_n=512):
    """z: (N, K) int, x: (N, 11) f32, emb_table: (1000, 8) f32,
    weight: (19, H) f32 (== torch W.T), bias: (H,) f32."""
    if z.ndim == 1:                                  # PyTorch handles 1-D z too
        z = z[:, None]
    z = z.astype(jnp.int32)
    x = x.astype(jnp.float32)
    n, k = z.shape
    xf = x.shape[1]
    v, e = emb_table.shape
    h = weight.shape[1]

    # ---- Offline weight prep (cacheable with the parameters) ----
    # Fold the embedding projection into the table: (V, H).
    fused_table = emb_table.astype(jnp.float32) @ weight[:e].astype(jnp.float32)
    v_pad = _round_up(v, 128)                        # 1000 -> 1024 lanes
    h_pad = _round_up(h, 128)                        # lane-dense output stores
    fused_table = jnp.pad(fused_table, ((0, v_pad - v), (0, h_pad - h)))
    fused_table = fused_table.astype(jnp.bfloat16)   # bf16 MXU contraction

    w_x = jnp.pad(weight[e:].astype(jnp.float32), ((0, 0), (0, h_pad - h)))
    b2 = jnp.pad(bias.astype(jnp.float32), (0, h_pad - h)).reshape(1, h_pad)

    # ---- Node tiling ----
    min_tile = 8
    n_rounded = _round_up(n, min_tile)
    tile_n = max(min_tile, min(tile_n, n_rounded))
    # Keep >= 2 grid steps when N allows so the "parallel" axis splits across
    # both TensorCores on v7x (neutral on single-TC v5e/v6e).
    if tile_n >= n_rounded and n_rounded >= 2 * min_tile:
        tile_n = _round_up(pl.cdiv(n_rounded, 2), min_tile)
    n_pad = _round_up(n, tile_n)
    if n_pad != n:
        z = jnp.pad(z, ((0, n_pad - n), (0, 0)))
        x = jnp.pad(x, ((0, n_pad - n), (0, 0)))

    out = pl.pallas_call(
        _encoder_kernel,
        out_shape=jax.ShapeDtypeStruct((n_pad, h_pad), jnp.float32),
        grid=(n_pad // tile_n,),
        in_specs=[
            pl.BlockSpec((tile_n, k), lambda i: (i, 0)),     # z: tiled over N
            pl.BlockSpec((tile_n, xf), lambda i: (i, 0)),    # x: tiled over N
            pl.BlockSpec((v_pad, h_pad), lambda i: (0, 0)),  # fused table: resident
            pl.BlockSpec((xf, h_pad), lambda i: (0, 0)),     # W_x: resident
            pl.BlockSpec((1, h_pad), lambda i: (0, 0)),      # bias: resident
        ],
        out_specs=pl.BlockSpec((tile_n, h_pad), lambda i: (i, 0)),
        compiler_params=pltpu.CompilerParams(
            dimension_semantics=("parallel",)),
    )(z, x, fused_table, w_x, b2)
    return out[:n, :h]


def _reference(z, x, emb_table, weight, bias):
    if z.ndim == 1:
        z = z[:, None]
    z_emb = emb_table[z].sum(axis=1)                      # (N, 8)
    feats = jnp.concatenate([z_emb, x], axis=-1)          # (N, 19)
    return feats @ weight + bias


if __name__ == "__main__":
    HIDDEN = 32
    N, K = 16, 3            # 16 nodes, 3 z-indices per node (summed)
    EMB_DIM, VOCAB = 8, 1000
    X_FEATS = 19 - EMB_DIM  # 11 raw node features (use_pos=False)

    key = jax.random.PRNGKey(0)
    kz, kx, kt, kw, kb = jax.random.split(key, 5)

    z = jax.random.randint(kz, (N, K), 0, VOCAB, dtype=jnp.int32)
    x = jax.random.normal(kx, (N, X_FEATS), dtype=jnp.float32)

    # Deterministic parameter init (Embedding ~ N(0,1), Linear ~ U(-1/sqrt(in), 1/sqrt(in)))
    emb_table = jax.random.normal(kt, (VOCAB, EMB_DIM), dtype=jnp.float32)
    bound = 1.0 / jnp.sqrt(19.0)
    weight = jax.random.uniform(kw, (19, HIDDEN), jnp.float32, -bound, bound)
    bias = jax.random.uniform(kb, (HIDDEN,), jnp.float32, -bound, bound)

    out = qm9_input_encoder(z, x, emb_table, weight, bias)
    out = jax.block_until_ready(out)

    ref = _reference(z, x, emb_table, weight, bias)
    assert out.shape == (N, HIDDEN)
    # bf16 embedding-table contraction -> relaxed (but tight) tolerance.
    assert jnp.allclose(out, ref, atol=2e-2, rtol=2e-2), "mismatch vs reference"
    print("KERNEL_OK")
</pallas_src>

<mosaic_0001>
module attributes {stable_mosaic.version = 11 : i64} {
  func.func @_encoder_kernel(%arg0: i32, %arg1: memref<8x3xi32, #tpu.memory_space<vmem>>, %arg2: memref<8x11xf32, #tpu.memory_space<vmem>>, %arg3: memref<1024x128xbf16, #tpu.memory_space<vmem>>, %arg4: memref<11x128xf32, #tpu.memory_space<vmem>>, %arg5: memref<1x128xf32, #tpu.memory_space<vmem>>, %arg6: memref<8x128xf32, #tpu.memory_space<vmem>>) attributes {dimension_semantics = [#tpu.dimension_semantics<parallel>], iteration_bounds = array<i64: 2>, scalar_prefetch = 0 : i64, scratch_operands = 0 : i64, tpu.core_type = #tpu.core_type<tc>, window_params = [{transform_indices = @transform_0, window_bounds = array<i64: 8, 3>}, {transform_indices = @transform_1, window_bounds = array<i64: 8, 11>}, {pipeline_mode = #tpu.pipeline_mode<synchronous>, transform_indices = @transform_2, window_bounds = array<i64: 1024, 128>}, {pipeline_mode = #tpu.pipeline_mode<synchronous>, transform_indices = @transform_3, window_bounds = array<i64: 11, 128>}, {pipeline_mode = #tpu.pipeline_mode<synchronous>, transform_indices = @transform_4, window_bounds = array<i64: 1, 128>}, {transform_indices = @transform_5, window_bounds = array<i64: 8, 128>}]} {
    %c0 = arith.constant 0 : index
    %c0_0 = arith.constant 0 : index
    %0 = vector.load %arg1[%c0, %c0_0] : memref<8x3xi32, #tpu.memory_space<vmem>>, vector<8x3xi32>
    %c0_1 = arith.constant 0 : index
    %c0_2 = arith.constant 0 : index
    %1 = vector.load %arg2[%c0_1, %c0_2] : memref<8x11xf32, #tpu.memory_space<vmem>>, vector<8x11xf32>
    %c0_3 = arith.constant 0 : index
    %c0_4 = arith.constant 0 : index
    %2 = vector.load %arg4[%c0_3, %c0_4] : memref<11x128xf32, #tpu.memory_space<vmem>>, vector<11x128xf32>
    %cst = arith.constant dense<0.000000e+00> : vector<8x128xf32>
    %3 = tpu.matmul %1, %2, %cst {dimension_numbers = #tpu.dot_dimension_numbers<[1], [0], [0], [1], [0, 0, 1, 1], [], []>} : vector<8x11xf32>, vector<11x128xf32>, vector<8x128xf32> -> vector<8x128xf32>
    %c0_5 = arith.constant 0 : index
    %c0_6 = arith.constant 0 : index
    %4 = vector.load %arg5[%c0_5, %c0_6] : memref<1x128xf32, #tpu.memory_space<vmem>>, vector<1x128xf32>
    %5 = vector.broadcast %4 : vector<1x128xf32> to vector<8x128xf32>
    %6 = arith.addf %3, %5 : vector<8x128xf32>
    %7 = tpu.iota {dimensions = array<i32: 1>} : vector<8x1024xi32>
    %8 = vector.extract_strided_slice %0 {offsets = [0, 0], sizes = [8, 1], strides = [1, 1]} : vector<8x3xi32> to vector<8x1xi32>
    %9 = vector.broadcast %8 : vector<8x1xi32> to vector<8x1024xi32>
    %10 = arith.cmpi eq, %7, %9 : vector<8x1024xi32>
    %11 = arith.extui %10 : vector<8x1024xi1> to vector<8x1024xi32>
    %12 = arith.sitofp %11 : vector<8x1024xi32> to vector<8x1024xf32>
    %13 = arith.truncf %12 : vector<8x1024xf32> to vector<8x1024xbf16>
    %c0_7 = arith.constant 0 : index
    %c0_8 = arith.constant 0 : index
    %14 = vector.load %arg3[%c0_7, %c0_8] : memref<1024x128xbf16, #tpu.memory_space<vmem>>, vector<1024x128xbf16>
    %cst_9 = arith.constant dense<0.000000e+00> : vector<8x128xf32>
    %15 = tpu.matmul %13, %14, %cst_9 {dimension_numbers = #tpu.dot_dimension_numbers<[1], [0], [0], [1], [0, 0, 1, 1], [], []>} : vector<8x1024xbf16>, vector<1024x128xbf16>, vector<8x128xf32> -> vector<8x128xf32>
    %16 = arith.addf %6, %15 : vector<8x128xf32>
    %17 = vector.extract_strided_slice %0 {offsets = [0, 1], sizes = [8, 1], strides = [1, 1]} : vector<8x3xi32> to vector<8x1xi32>
    %18 = vector.broadcast %17 : vector<8x1xi32> to vector<8x1024xi32>
    %19 = arith.cmpi eq, %7, %18 : vector<8x1024xi32>
    %20 = arith.extui %19 : vector<8x1024xi1> to vector<8x1024xi32>
    %21 = arith.sitofp %20 : vector<8x1024xi32> to vector<8x1024xf32>
    %22 = arith.truncf %21 : vector<8x1024xf32> to vector<8x1024xbf16>
    %c0_10 = arith.constant 0 : index
    %c0_11 = arith.constant 0 : index
    %23 = vector.load %arg3[%c0_10, %c0_11] : memref<1024x128xbf16, #tpu.memory_space<vmem>>, vector<1024x128xbf16>
    %cst_12 = arith.constant dense<0.000000e+00> : vector<8x128xf32>
    %24 = tpu.matmul %22, %23, %cst_12 {dimension_numbers = #tpu.dot_dimension_numbers<[1], [0], [0], [1], [0, 0, 1, 1], [], []>} : vector<8x1024xbf16>, vector<1024x128xbf16>, vector<8x128xf32> -> vector<8x128xf32>
    %25 = arith.addf %16, %24 : vector<8x128xf32>
    %26 = vector.extract_strided_slice %0 {offsets = [0, 2], sizes = [8, 1], strides = [1, 1]} : vector<8x3xi32> to vector<8x1xi32>
    %27 = vector.broadcast %26 : vector<8x1xi32> to vector<8x1024xi32>
    %28 = arith.cmpi eq, %7, %27 : vector<8x1024xi32>
    %29 = arith.extui %28 : vector<8x1024xi1> to vector<8x1024xi32>
    %30 = arith.sitofp %29 : vector<8x1024xi32> to vector<8x1024xf32>
    %31 = arith.truncf %30 : vector<8x1024xf32> to vector<8x1024xbf16>
    %c0_13 = arith.constant 0 : index
    %c0_14 = arith.constant 0 : index
    %32 = vector.load %arg3[%c0_13, %c0_14] : memref<1024x128xbf16, #tpu.memory_space<vmem>>, vector<1024x128xbf16>
    %cst_15 = arith.constant dense<0.000000e+00> : vector<8x128xf32>
    %33 = tpu.matmul %31, %32, %cst_15 {dimension_numbers = #tpu.dot_dimension_numbers<[1], [0], [0], [1], [0, 0, 1, 1], [], []>} : vector<8x1024xbf16>, vector<1024x128xbf16>, vector<8x128xf32> -> vector<8x128xf32>
    %34 = arith.addf %25, %33 : vector<8x128xf32>
    %c0_16 = arith.constant 0 : index
    %c0_17 = arith.constant 0 : index
    %35 = vector.load %arg6[%c0_16, %c0_17] : memref<8x128xf32, #tpu.memory_space<vmem>>, vector<8x128xf32>
    tpu.vector_store %arg6[%c0_16, %c0_17], %34 {strides = array<i32>} : memref<8x128xf32, #tpu.memory_space<vmem>>, vector<8x128xf32>,
    return
  }
  func.func @transform_0(%arg0: i32) -> (i32, i32) {
    %c0_i32 = arith.constant 0 : i32
    %c0_i32_0 = arith.constant 0 : i32
    return %arg0, %c0_i32 : i32, i32
  }
  func.func @transform_1(%arg0: i32) -> (i32, i32) {
    %c0_i32 = arith.constant 0 : i32
    %c0_i32_0 = arith.constant 0 : i32
    return %arg0, %c0_i32 : i32, i32
  }
  func.func @transform_2(%arg0: i32) -> (i32, i32) {
    %c0_i32 = arith.constant 0 : i32
    %c0_i32_0 = arith.constant 0 : i32
    %c0_i32_1 = arith.constant 0 : i32
    return %c0_i32, %c0_i32_0 : i32, i32
  }
  func.func @transform_3(%arg0: i32) -> (i32, i32) {
    %c0_i32 = arith.constant 0 : i32
    %c0_i32_0 = arith.constant 0 : i32
    %c0_i32_1 = arith.constant 0 : i32
    return %c0_i32, %c0_i32_0 : i32, i32
  }
  func.func @transform_4(%arg0: i32) -> (i32, i32) {
    %c0_i32 = arith.constant 0 : i32
    %c0_i32_0 = arith.constant 0 : i32
    %c0_i32_1 = arith.constant 0 : i32
    return %c0_i32, %c0_i32_0 : i32, i32
  }
  func.func @transform_5(%arg0: i32) -> (i32, i32) {
    %c0_i32 = arith.constant 0 : i32
    %c0_i32_0 = arith.constant 0 : i32
    return %arg0, %c0_i32 : i32, i32
  }
}

</mosaic_0001>

<bundles_post_ra>
// kernel: tpu_custom_call.1
= control target key start
LH: loop header
LB: loop body
LE: loop exit
PB: predicated region body
PF: predicated region fallthrough
CT: control target
= control target key end

     0   :  { %10 = vsyncpa [#allocation3], 0  ;;  %s2921_s0 = inlined_call_operand.vmem [shape: s32[16,3], index: 0, kind: input, shape index: {}]   ;;  %s2922_s1 = inlined_call_operand.vmem [shape: f32[16,11], index: 1, kind: input, shape index: {}]   ;;  %s2923_s2 = inlined_call_operand.hbm [shape: bf16[1024,128], index: 2, kind: input, shape index: {}]   ;;  %s2924_s3 = inlined_call_operand.hbm [shape: f32[11,128], index: 3, kind: input, shape index: {}]   ;;  %s2925_s4 = inlined_call_operand.vmem [shape: f32[1,128], index: 4, kind: input, shape index: {}]   ;;  %s2926_s5 = inlined_call_operand.hbm [shape: f32[16,128], index: 5, kind: output, shape index: {}]  }
   0x1   :  { %11 = vsyncpa [#allocation6], 0 }
   0x2   :  { %12 = vsyncpa [#allocation4], 0 }
   0x3   :  { %14 = vsyncpa [#allocation4 + $0x1], 0  ;;  %s2319_s18 = smov 0   ;;  %s2321_s19 = smov 0  }
   0x4   :  { %s2323_s20 = smov 0   ;;  %s2325_s21 = smov 0  }
   0x5 LB: > { %s2340_s22 = sadd.s32 4294967295, %s2272_s21   ;;  %s1574_s23 = sadd.s32 4294967294, %s2272_s21   ;;  %s2272_s21 = sphi %s2325_s21, %s3025_s21   ;;  %s2268_s20 = sphi %s2323_s20, %s3024_s20   ;;  %s2264_s19 = sphi %s2321_s19, %s3023_s19   ;;  %s2260_s18 = sphi %s2319_s18, %s3022_s18  }
   0x6   : > { %s2344_s24 = sadd.s32 1, %s2272_s21   ;;  %s142_s25 = sadd.s32 1, %s2268_s20 }
   0x7   : > { %s139_s26 = ssub.s32 %s2272_s21, %s2344_s24  ;;  %p152_p0 = scmp.ne.s32.totalorder %s2268_s20, %s2264_s19 }
   0x8   : > { %p140_p1 = scmp.eq.s32.totalorder %s139_s26, 0  ;;  %p153_p2 = scmp.eq.s32.totalorder %s2340_s22, 1 }
   0x9   : > { %p158_p3 = scmp.ne.s32.totalorder %s2264_s19, %s2260_s18  ;;  %p159_p4 = scmp.eq.s32.totalorder %s1574_s23, 1 }
   0xa   : > { %s2355_s27 = scalar_select %p140_p1, %s2268_s20, %s142_s25  }
   0xb   : > { %p2357_p5 = por %p153_p2, %p152_p0  ;;  %p2361_p6 = por %p159_p4, %p158_p3 }
   0xc   : > { %p1575_p7 = scmp.ge.s32.totalorder %s2272_s21, 1  ;;  %p166_p8 = scmp.lt.s32.totalorder %s2272_s21, 3 }
   0xd   : > { %s2964_s28 = scalar_select %p2357_p5, 1, 0 }
   0xe   : > { %s2965_s29 = scalar_select %p2361_p6, 1, 0 }
   0xf   : > { %p2927_p9 = scmp.eq.s32.totalorder %s2340_s22, 0  ;;  %p2368_p10 = pnand %p1575_p7, %p166_p8 }
  0x10   : > { %s2274_s6 = smov [#allocation2]   ;;  %s2275_s9 = smov [#allocation5]  }
  0x11   : > { %s2966_s30 = scalar_select %p2368_p10, 1, 0 }
  0x12   : > { %s178_s7 = sshll.u32 %s2274_s6, 4  ;;  %p2016_p11 = pneg %p2368_p10  ;;  %s179_s7 = int_to_ptr.vmem [resolvable:$true] %s178_s7 }
  0x13   : > { %s191_s10 = sshll.u32 %s2275_s9, 4  ;;  %s2146_s13 = scalar_lea.hbm %s2923_s2, 8192  ;;  %s2380_s10 = int_to_ptr.vmem [resolvable:$true] %s191_s10 }
  0x14   : > { %p2376_p12 = pnand %p2927_p9, %p2016_p11  ;;  %p2147_p13 = scmp.ne.s32.totalorder %s2923_s2, %s2146_s13 }
  0x15   : > { %p2153_p3 = scmp.lt.u32.totalorder %s2146_s13, %s2923_s2 }
  0x16   : > { %p2148_p0 = pneg %p2376_p12 }
  0x18   : > { %p2149_p1 = pnand %p2148_p0, %p2147_p13 }
  0x1a   : > { %p2150_p2 = pneg %p2149_p1 }
  0x1c   : > { %p2155_p4 = pnand %p2153_p3, %p2150_p2 }
  0x1e   : > { %2158 = shalt.err (!%p2155_p4)
}
  0x1f   : > { %s2159_s23 = scalar_lea.vmem %s179_s7, 8192  ;;  %p2167_p9 = scmp.lt.s32.totalorder %s179_s7, %s179_s7 }
  0x20   : > { %p2160_p7 = scmp.ne.s32.totalorder %s179_s7, %s2159_s23  ;;  %p2168_p6 = scmp.lt.s32.totalorder %s2159_s23, %s2159_s23 }
  0x22   : > { %p2162_p8 = pnand %p2160_p7, %p2148_p0  ;;  %p2169_p5 = por %p2168_p6, %p2167_p9 }
  0x24   : > { %p2163_p11 = pneg %p2162_p8 }
  0x26   : > { %p2170_p10 = pnand %p2169_p5, %p2163_p11 }
  0x28   : > { %2173 = shalt.err (!%p2170_p10)
}
  0x29   : > { %s2276_s25 = smov 64   ;;  %s2277_s26 = smov 4  }
  0x2a   : > { %2019 = dma.hbm_to_vmem [thread:$0]  (!%p2376_p12), %s2923_s2, 8192, %s179_s7, [#allocation3], %s2276_s25, %s2276_s25, %s2277_s26  }
  0x2b   : > { %s2174_s13 = scalar_lea.hbm %s2924_s3, 256 }
  0x2c   : > { %p2175_p13 = scmp.ne.s32.totalorder %s2924_s3, %s2174_s13  ;;  %p2181_p9 = scmp.lt.u32.totalorder %s2174_s13, %s2924_s3 }
  0x2e   : > { %p2177_p5 = pnand %p2175_p13, %p2148_p0 }
  0x30   : > { %p2178_p6 = pneg %p2177_p5 }
  0x32   : > { %p2183_p10 = pnand %p2181_p9, %p2178_p6 }
  0x34   : > { %2186 = shalt.err (!%p2183_p10)
}
  0x35   : > { %s2187_s7 = scalar_lea.vmem %s2380_s10, 256  ;;  %p2195_p4 = scmp.lt.s32.totalorder %s2380_s10, %s2380_s10 }
  0x36   : > { %p2188_p1 = scmp.ne.s32.totalorder %s2380_s10, %s2187_s7  ;;  %p2196_p7 = scmp.lt.s32.totalorder %s2187_s7, %s2187_s7 }
  0x38   : > { %p2190_p2 = pnand %p2188_p1, %p2148_p0  ;;  %p2197_p8 = por %p2196_p7, %p2195_p4 }
  0x3a   : > { %p2191_p3 = pneg %p2190_p2 }
  0x3c   : > { %p2198_p11 = pnand %p2197_p8, %p2191_p3 }
  0x3e   : > { %2201 = shalt.err (!%p2198_p11)
}
  0x3f   : > { %s2278_s23 = smov 128   ;;  %s2279_s25 = smov 8  }
  0x40   : > { %2022 = dma.hbm_to_vmem [thread:$0]  (!%p2376_p12), %s2924_s3, 256, %s2380_s10, [#allocation6], %s2278_s23, %s2278_s23, %s2279_s25  }
  0x41   : > { %p2968_p13 = scmp.ne.s32.totalorder %s2966_s30, 0 }
  0x43   : > { %224 = sbr.rel (%p2968_p13) target bundleno = 614 (0x266), region = 40 }
  0x4a   : > { %p2969_p0 = scmp.eq.s32.totalorder %s2340_s22, 0 }
  0x4c   : > { %2247 = dma.done.wait (%p2969_p0), [#allocation3], 8192   ;;  %p2970_p5 = pmov %p2969_p0 }
  0x4d   : > { %p2971_p6 = pmov %p2969_p0 }
  0x4e   : > { %2249 = vsyncadd (%p2970_p5), [#allocation3], 4294959104 }
  0x4f   : > { %2251 = dma.done.wait (%p2971_p6), [#allocation6], 256   ;;  %p2972_p9 = pmov %p2969_p0 }
  0x50   : > { %p259_p10 = scmp.lt.s32.totalorder %s2340_s22, 1  ;;  %v2280_v0 = vmov 0   ;;  %v2281_v1 = vmov 0.0|0.0   ;;  %vm2282_vm0 = vmmov 0   ;;  %v2283_v2 = vmov 0.0   ;;  %v270_v5 = vld [vmem:[#allocation5] sm:$0xff] }
  0x51   : > { %2253 = vsyncadd (%p2972_p9), [#allocation6], 4294967040  ;;  %2078 = vset.pattern.permute.xlu0 %v2280_v0  ;;  %2002 = vmatprep.subr.bf16.mxu0 %v2281_v1  ;;  %vm283_vm1 = vcmask 1042432   ;;  %v2284_v3 = vmov 2   ;;  %vm2285_vm2 = vmmov 1   ;;  %v2447_v8 = vld [vmem:[#allocation2 + $0x40] sm:$0xff]   ;;  %v357_v44 = vlaneseq }
  0x52   : > { %s260_s30 = scalar_select %p259_p10, %s2340_s22, 1  ;;  %1999 = vmatprep.mubr.msk.f32.mxu0 %vm2282_vm0, %v2283_v2  ;;  %2080 = vset.pattern.permute.xlu1 %v2284_v3  ;;  %vm2004_vm3 = vmpackc.low %vm283_vm1, %vm2285_vm2  ;;  %v271_v6 = vld [vmem:[#allocation5 + $0x8] sm:$0x7]  ;;  %v2449_v9 = vld [vmem:[#allocation2 + $0xc0] sm:$0xff]   ;;  %vm279_vm4 = vcmask 89088   ;;  %v2286_v12 = vmov 1  }
  0x53   : > { %v2003_v7 = vpack.c.bf16 %v271_v6, %v270_v5  ;;  %1731 = vmatprep.subr.bf16.mxu1 %v2447_v8  ;;  %v2453_v11 = vld [vmem:[#allocation2] sm:$0xff]   ;;  %v2457_v14 = vld [vmem:[#allocation2 + $0x48] sm:$0xff]   ;;  %v2469_v18 = vld [vmem:[#allocation2 + $0x50] sm:$0xff]   ;;  %v2549_v45 = vand.u32 127, %v357_v44  ;;  %v2930_v53 = vmov 1.0|1.0  }
  0x54   : > { %s1583_s8 = sshll.u32 %s260_s30, 3  ;;  %v2455_v13 = vld [vmem:[#allocation2 + $0x80] sm:$0xff]   ;;  %1732 = vmatpush3.bf16.msra.mxu1 %v2453_v11  ;;  %v2461_v15 = vld [vmem:[#allocation2 + $0xc8] sm:$0xff]   ;;  %v2473_v19 = vld [vmem:[#allocation2 + $0xd0] sm:$0xff]   ;;  %s256_s17 = sand.u32 1, %s2264_s19  }
  0x55   : > { %s262_s11 = scalar_lea.vmem %s2921_s0, %s1583_s8  ;;  %s266_s14 = scalar_lea.vmem %s2922_s1, %s1583_s8  ;;  %2005 = vmatpush3.bf16.msk.msra.mxu0 %vm2004_vm3, %v2003_v7  ;;  %1733 = vmatprep.subr.bf16.mxu1 %v2457_v14  ;;  %v2464_v16 = vld [vmem:[#allocation2 + $0x8] sm:$0xff]   ;;  %v2476_v20 = vld [vmem:[#allocation2 + $0x10] sm:$0xff]   ;;  %v2481_v22 = vld [vmem:[#allocation2 + $0x58] sm:$0xff]   ;;  %v2552_v46 = vadd.s32 128, %v2549_v45  ;;  %v2555_v47 = vadd.s32 384, %v2549_v45  ;;  %v2558_v48 = vadd.s32 256, %v2549_v45 }
  0x56   : > { %v268_v4 = vld [vmem:[%s262_s11] sm:$0xff]  ;;  %1753 = vmatprep.subr.bf16.mxu0 %v2449_v9  ;;  %v2467_v17 = vld [vmem:[#allocation2 + $0x88] sm:$0xff]   ;;  %v2485_v23 = vld [vmem:[#allocation2 + $0xd8] sm:$0xff]   ;;  %v2561_v49 = vadd.s32 640, %v2549_v45  ;;  %v2566_v51 = vadd.s32 896, %v2549_v45  ;;  %s1582_s7 = sshll.u32 %s256_s17, 3 }
  0x57   : > { %367 = vperm.xlu0 %2078, %v268_v4   ;;  %1271 = vperm.xlu1 %2080, %v268_v4   ;;  %v269_v10 = vld [vmem:[%s266_s14] sm:$0xff]  ;;  %v2488_v24 = vld [vmem:[#allocation2 + $0x18] sm:$0xff]   ;;  %v2493_v26 = vld [vmem:[#allocation2 + $0x60] sm:$0xff]   ;;  %s1725_s23 = sshll.u32 %s2340_s22, 7  ;;  %s258_s25 = scalar_lea.vmem [#allocation7], %s1582_s7 }
  0x58   : > { %2000 = vmatmul.mubr.msk.f32.vlgmr.msra.gmra.mrb[0].mxu0 %vm279_vm4, %v269_v10  ;;  %1734 = vmatpush3.bf16.msra.mxu1 %v2464_v16  ;;  %v2479_v21 = vld [vmem:[#allocation2 + $0x90] sm:$0xff]   ;;  %v2491_v25 = vld [vmem:[#allocation2 + $0x98] sm:$0xff]   ;;  %v2497_v27 = vld [vmem:[#allocation2 + $0xe0] sm:$0xff]   ;;  %s1481_s26 = sshll.u32 %s258_s25, 4  ;;  %s2879_s8 = scalar_lea.hbm %s2926_s5, %s1725_s23  ;;  %s2881_s26 = int_to_ptr.vmem [resolvable:$true] %s1481_s26 }
  0x59   : > { %1754 = vmatpush3.bf16.msra.mxu0 %v2455_v13  ;;  %1735 = vmatprep.subr.bf16.mxu1 %v2469_v18  ;;  %v2500_v28 = vld [vmem:[#allocation2 + $0x20] sm:$0xff]   ;;  %v2505_v30 = vld [vmem:[#allocation2 + $0x68] sm:$0xff]   ;;  %v2517_v34 = vld [vmem:[#allocation2 + $0x70] sm:$0xff]   ;;  %s1468_s10 = scalar_lea.sflag [#allocation4], %s256_s17  ;;  %s2202_s9 = scalar_lea.vmem %s2881_s26, 128 }
  0x5a   : > { %1755 = vmatprep.subr.bf16.mxu0 %v2461_v15  ;;  %v2503_v29 = vld [vmem:[#allocation2 + $0xa0] sm:$0xff]   ;;  %v2509_v31 = vld [vmem:[#allocation2 + $0xe8] sm:$0xff]   ;;  %v2521_v35 = vld [vmem:[#allocation2 + $0xf0] sm:$0xff]   ;;  %p2203_p12 = scmp.ne.s32.totalorder %s2881_s26, %s2202_s9  ;;  %p3020_p1 = scmp.ne.s32.totalorder %s2964_s28, 0 }
  0x5b   : > { %2079 = vset.pattern.permute.xlu0 %v2286_v12  ;;  %v2512_v32 = vld [vmem:[#allocation2 + $0x28] sm:$0xff]   ;;  %v2524_v36 = vld [vmem:[#allocation2 + $0x30] sm:$0xff]   ;;  %v2529_v38 = vld [vmem:[#allocation2 + $0x78] sm:$0xff]   ;;  %s2288_s22 = smov [#allocation7]  }
  0x5c   : > { %1075 = vperm.xlu0 %2079, %v268_v4   ;;  %1736 = vmatpush3.bf16.msra.mxu1 %v2476_v20  ;;  %v2515_v33 = vld [vmem:[#allocation2 + $0xa8] sm:$0xff]   ;;  %v2527_v37 = vld [vmem:[#allocation2 + $0xb0] sm:$0xff]   ;;  %v2533_v39 = vld [vmem:[#allocation2 + $0xf8] sm:$0xff]   ;;  %p2204_p2 = pnand %p2203_p12, %p3020_p1  ;;  %s2206_s11 = sshll.u32 %s2288_s22, 4  ;;  %s2207_s11 = int_to_ptr.vmem [resolvable:$false] %s2206_s11 }
  0x5d   : > { %1756 = vmatpush3.bf16.msra.mxu0 %v2467_v17  ;;  %1737 = vmatprep.subr.bf16.mxu1 %v2481_v22  ;;  %v2536_v40 = vld [vmem:[#allocation2 + $0x38] sm:$0xff]   ;;  %v2541_v42 = vld [vmem:[#allocation2 + $0x140] sm:$0xff]   ;;  %v2586_v55 = vld [vmem:[#allocation2 + $0x148] sm:$0xff]   ;;  %s2208_s12 = scalar_lea.vmem %s2207_s11, 256  ;;  %p2209_p4 = scmp.lt.s32.totalorder %s2881_s26, %s2207_s11 }
  0x5e   : > { %1757 = vmatprep.subr.bf16.mxu0 %v2473_v19  ;;  %v2539_v41 = vld [vmem:[#allocation2 + $0xb8] sm:$0xff]   ;;  %v2545_v43 = vld [vmem:[#allocation2 + $0x1c0] sm:$0xff]   ;;  %v2589_v56 = vld [vmem:[#allocation2 + $0x1c8] sm:$0xff]   ;;  %p2205_p3 = pneg %p2204_p2  ;;  %p2210_p7 = scmp.lt.s32.totalorder %s2208_s12, %s2202_s9 }
  0x5f   : > { %v2576_v52 = vld [vmem:[#allocation2 + $0x100] sm:$0xff]   ;;  %2973 = vst [vmem:[#allocation11_spill] sm:$0xff] %v2589_v56  ;;  %v2593_v57 = vld [vmem:[#allocation2 + $0x108] sm:$0xff]   ;;  %v2599_v59 = vld [vmem:[#allocation2 + $0x150] sm:$0xff]  }
  0x60   : > { %2081 = vset.pattern.permute.xlu0 %v2284_v3  ;;  %1738 = vmatpush3.bf16.msra.mxu1 %v2488_v24  ;;  %v2579_v54 = vld [vmem:[#allocation2 + $0x180] sm:$0xff]   ;;  %2974 = vst [vmem:[#allocation12_spill] sm:$0xff] %v2593_v57  ;;  %v2597_v58 = vld [vmem:[#allocation2 + $0x188] sm:$0xff]   ;;  %2976 = vst [vmem:[#allocation14_spill] sm:$0xff] %v2599_v59  ;;  %p2211_p8 = por %p2210_p7, %p2209_p4 }
  0x61   : > { %1758 = vmatpush3.bf16.msra.mxu0 %v2479_v21  ;;  %1739 = vmatprep.subr.bf16.mxu1 %v2493_v26  ;;  %2975 = vst [vmem:[#allocation13_spill] sm:$0xff] %v2597_v58  ;;  %v2603_v60 = vld [vmem:[#allocation2 + $0x1d0] sm:$0xff]   ;;  %v2613_v63 = vld [vmem:[#allocation2 + $0x158] sm:$0xff]   ;;  %v2625_v3 = vld [vmem:[#allocation2 + $0x160] sm:$0xff]  }
  0x62   : > { %1759 = vmatprep.subr.bf16.mxu0 %v2485_v23  ;;  %2977 = vst [vmem:[#allocation15_spill] sm:$0xff] %v2603_v60  ;;  %v2607_v61 = vld [vmem:[#allocation2 + $0x110] sm:$0xff]   ;;  %2980 = vst [vmem:[#allocation18_spill] sm:$0xff] %v2613_v63  ;;  %v2616_v0 = vld [vmem:[#allocation2 + $0x1d8] sm:$0xff]   ;;  %p2212_p11 = pnand %p2211_p8, %p2205_p3 }
  0x63   : > { %2978 = vst [vmem:[#allocation16_spill] sm:$0xff] %v2607_v61  ;;  %v2611_v62 = vld [vmem:[#allocation2 + $0x190] sm:$0xff]   ;;  %2981 = vst [vmem:[#allocation19_spill] sm:$0xff] %v2616_v0  ;;  %v2619_v1 = vld [vmem:[#allocation2 + $0x118] sm:$0xff]  }
  0x64   : > { %1740 = vmatpush3.bf16.msra.mxu1 %v2500_v28  ;;  %2979 = vst [vmem:[#allocation17_spill] sm:$0xff] %v2611_v62  ;;  %2982 = vst [vmem:[#allocation20_spill] sm:$0xff] %v2619_v1  ;;  %v2623_v2 = vld [vmem:[#allocation2 + $0x198] sm:$0xff]   ;;  %v2628_v4 = vld [vmem:[#allocation2 + $0x1e0] sm:$0xff]  }
  0x65   : > { %1760 = vmatpush3.bf16.msra.mxu0 %v2491_v25  ;;  %1741 = vmatprep.subr.bf16.mxu1 %v2505_v30  ;;  %2983 = vst [vmem:[#allocation21_spill] sm:$0xff] %v2623_v2  ;;  %2984 = vst [vmem:[#allocation22_spill] sm:$0xff] %v2625_v3  ;;  %v2631_v5 = vld [vmem:[#allocation2 + $0x120] sm:$0xff]   ;;  %v2637_v7 = vld [vmem:[#allocation2 + $0x168] sm:$0xff]  }
  0x66   : > { %1761 = vmatprep.subr.bf16.mxu0 %v2497_v27  ;;  %2985 = vst [vmem:[#allocation23_spill] sm:$0xff] %v2628_v4  ;;  %2986 = vst [vmem:[#allocation24_spill] sm:$0xff] %v2631_v5  ;;  %v2635_v6 = vld [vmem:[#allocation2 + $0x1a0] sm:$0xff]   ;;  %v2640_v10 = vld [vmem:[#allocation2 + $0x1e8] sm:$0xff]  }
  0x67   : > { %2987 = vst [vmem:[#allocation25_spill] sm:$0xff] %v2635_v6  ;;  %2988 = vst [vmem:[#allocation26_spill] sm:$0xff] %v2637_v7  ;;  %v2643_v12 = vld [vmem:[#allocation2 + $0x128] sm:$0xff]  }
  0x68   : > { %1742 = vmatpush3.bf16.msra.mxu1 %v2512_v32  ;;  %2989 = vst [vmem:[#allocation27_spill] sm:$0xff] %v2640_v10  ;;  %2990 = vst [vmem:[#allocation28_spill] sm:$0xff] %v2643_v12  ;;  %v2647_v44 = vld [vmem:[#allocation2 + $0x1a8] sm:$0xff]  }
  0x69   : > { %1762 = vmatpush3.bf16.msra.mxu0 %v2503_v29  ;;  %1743 = vmatprep.subr.bf16.mxu1 %v2517_v34  ;;  %2991 = vst [vmem:[#allocation29_spill] sm:$0xff] %v2647_v44 }
  0x6a   : > { %1763 = vmatprep.subr.bf16.mxu0 %v2509_v31 }
  0x6c   : > { %1744 = vmatpush3.bf16.msra.mxu1 %v2524_v36 }
  0x6d   : > { %1764 = vmatpush3.bf16.msra.mxu0 %v2515_v33  ;;  %1745 = vmatprep.subr.bf16.mxu1 %v2529_v38 }
  0x6e   : > { %1765 = vmatprep.subr.bf16.mxu0 %v2521_v35 }
  0x70   : > { %1746 = vmatpush3.bf16.msra.mxu1 %v2536_v40 }
  0x71   : > { %1766 = vmatpush3.bf16.msra.mxu0 %v2527_v37  ;;  %1775 = vmatprep.subr.bf16.mxu1 %v2541_v42 }
  0x72   : > { %1767 = vmatprep.subr.bf16.mxu0 %v2533_v39 }
  0x75   : > { %1768 = vmatpush3.bf16.msra.mxu0 %v2539_v41 }
  0x76   : > { %1797 = vmatprep.subr.bf16.mxu0 %v2545_v43 }
  0xd6   : > { %v2563_v50 = vpop.permute.xlu0 %367 }
  0xd7   : > { %vm370_vm5 = vcmp.eq.s32.totalorder %v2552_v46, %v2563_v50  ;;  %vm372_vm6 = vcmp.eq.s32.totalorder %v2555_v47, %v2563_v50  ;;  %vm369_vm7 = vcmp.eq.s32.totalorder %v2549_v45, %v2563_v50  ;;  %vm371_vm9 = vcmp.eq.s32.totalorder %v2558_v48, %v2563_v50 }
  0xd8   : > { %vm1660_vm8 = vmpackc.low %vm370_vm5, %vm370_vm5  ;;  %vm374_vm11 = vcmp.eq.s32.totalorder %v2561_v49, %v2563_v50  ;;  %vm376_vm13 = vcmp.eq.s32.totalorder %v2566_v51, %v2563_v50 }
  0xd9   : > { %1661 = vmatprep.mubr.msk.bf16.mxu1 %vm1660_vm8, %v2930_v53  ;;  %vm1664_vm10 = vmpackc.low %vm372_vm6, %vm372_vm6 }
  0xda   : > { %1665 = vmatprep.mubr.msk.bf16.mxu0 %vm1664_vm10, %v2930_v53  ;;  %vm1662_vm12 = vmpackc.low %vm369_vm7, %vm369_vm7 }
  0xdb   : > { %1663 = vmatmul.mubr.msk.bf16.vlgmr.msra.gmra.mrb[0].mxu1 %vm1662_vm12, %v2930_v53  ;;  %vm1666_vm14 = vmpackc.low %vm371_vm9, %vm371_vm9 }
  0xdc   : > { %1667 = vmatmul.mubr.msk.bf16.vlgmr.msra.gmra.mrb[4].mxu0 %vm1666_vm14, %v2930_v53  ;;  %1776 = vmatpush3.bf16.msra.mxu1 %v2576_v52  ;;  %vm1668_vm15 = vmpackc.low %vm374_vm11, %vm374_vm11 }
  0xdd   : > { %1798 = vmatpush3.bf16.msra.mxu0 %v2579_v54  ;;  %1669 = vmatprep.mubr.msk.bf16.mxu1 %vm1668_vm15, %v2930_v53  ;;  %vm1672_vm0 = vmpackc.low %vm376_vm13, %vm376_vm13 }
  0xde   : > { %1673 = vmatprep.mubr.msk.bf16.mxu0 %vm1672_vm0, %v2930_v53  ;;  %1777 = vmatprep.subr.bf16.mxu1 %v2586_v55  ;;  %v2649_v53 = vld [vmem:[#allocation2 + $0x170] sm:$0xff]  }
  0xdf   : > { %1799 = vmatprep.subr.bf16.mxu0 %v2589_v56  ;;  %2992 = vst [vmem:[#allocation30_spill] sm:$0xff] %v2649_v53 }
  0xe0   : > { %1778 = vmatpush3.bf16.msra.mxu1 %v2593_v57 }
  0xe1   : > { %1800 = vmatpush3.bf16.msra.mxu0 %v2597_v58  ;;  %1779 = vmatprep.subr.bf16.mxu1 %v2599_v59 }
  0xe2   : > { %1801 = vmatprep.subr.bf16.mxu0 %v2603_v60 }
  0xe4   : > { %1780 = vmatpush3.bf16.msra.mxu1 %v2607_v61 }
  0xe5   : > { %1802 = vmatpush3.bf16.msra.mxu0 %v2611_v62  ;;  %1781 = vmatprep.subr.bf16.mxu1 %v2613_v63 }
  0xe6   : > { %1803 = vmatprep.subr.bf16.mxu0 %v2616_v0 }
  0xe8   : > { %1782 = vmatpush3.bf16.msra.mxu1 %v2619_v1 }
  0xe9   : > { %1804 = vmatpush3.bf16.msra.mxu0 %v2623_v2  ;;  %1783 = vmatprep.subr.bf16.mxu1 %v2625_v3  ;;  %v2652_v3 = vld [vmem:[#allocation2 + $0x1f0] sm:$0xff]   ;;  %v2670_v2 = vadd.s32 768, %v2549_v45 }
  0xea   : > { %1805 = vmatprep.subr.bf16.mxu0 %v2628_v4  ;;  %v2655_v4 = vld [vmem:[#allocation2 + $0x130] sm:$0xff]  }
  0xeb   : > { %vm375_vm2 = vcmp.eq.s32.totalorder %v2670_v2, %v2563_v50 }
  0xec   : > { %1784 = vmatpush3.bf16.msra.mxu1 %v2631_v5  ;;  %v2659_v5 = vld [vmem:[#allocation2 + $0x1b0] sm:$0xff]   ;;  %vm1674_vm6 = vmpackc.low %vm375_vm2, %vm375_vm2 }
  0xed   : > { %1806 = vmatpush3.bf16.msra.mxu0 %v2635_v6  ;;  %1785 = vmatprep.subr.bf16.mxu1 %v2637_v7  ;;  %v2661_v6 = vld [vmem:[#allocation2 + $0x178] sm:$0xff]  }
  0xee   : > { %1807 = vmatprep.subr.bf16.mxu0 %v2640_v10  ;;  %v2664_v7 = vld [vmem:[#allocation2 + $0x1f8] sm:$0xff]   ;;  %v2667_v10 = vadd.s32 512, %v2549_v45 }
  0xf0   : > { %1786 = vmatpush3.bf16.msra.mxu1 %v2643_v12  ;;  %2993 = vst [vmem:[#allocation31_spill] sm:$0xff] %v2667_v10  ;;  %v2673_v12 = vld [vmem:[#allocation2 + $0x138] sm:$0xff]   ;;  %vm373_vm1 = vcmp.eq.s32.totalorder %v2667_v10, %v2563_v50  ;;  %v2994_v10 = vmov 1.0|1.0   ;;  %v2995_v50 = vld [vmem:[#allocation21_spill] sm:$0xff] }
  0xf1   : > { %1808 = vmatpush3.bf16.msra.mxu0 %v2647_v44  ;;  %1787 = vmatprep.subr.bf16.mxu1 %v2649_v53  ;;  %v2677_v53 = vld [vmem:[#allocation2 + $0x1b8] sm:$0xff]   ;;  %v2679_v44 = vpop.permute.xlu0 %1075  ;;  %vm1670_vm4 = vmpackc.low %vm373_vm1, %vm373_vm1 }
  0xf2   : > { %1809 = vmatprep.subr.bf16.mxu0 %v2652_v3  ;;  %vm1078_vm3 = vcmp.eq.s32.totalorder %v2552_v46, %v2679_v44  ;;  %vm1080_vm5 = vcmp.eq.s32.totalorder %v2555_v47, %v2679_v44  ;;  %vm1077_vm9 = vcmp.eq.s32.totalorder %v2549_v45, %v2679_v44  ;;  %vm1079_vm10 = vcmp.eq.s32.totalorder %v2558_v48, %v2679_v44 }
  0xf3   : > { %vm1684_vm7 = vmpackc.low %vm1078_vm3, %vm1078_vm3  ;;  %vm1082_vm11 = vcmp.eq.s32.totalorder %v2561_v49, %v2679_v44  ;;  %vm1084_vm13 = vcmp.eq.s32.totalorder %v2566_v51, %v2679_v44  ;;  %vm1083_vm2 = vcmp.eq.s32.totalorder %v2670_v2, %v2679_v44 }
  0xf4   : > { %1788 = vmatpush3.bf16.msra.mxu1 %v2655_v4  ;;  %vm1688_vm8 = vmpackc.low %vm1080_vm5, %vm1080_vm5 }
  0xf5   : > { %1810 = vmatpush3.bf16.msra.mxu0 %v2659_v5  ;;  %1789 = vmatprep.subr.bf16.mxu1 %v2661_v6  ;;  %vm1686_vm12 = vmpackc.low %vm1077_vm9, %vm1077_vm9 }
  0xf6   : > { %1811 = vmatprep.subr.bf16.mxu0 %v2664_v7  ;;  %vm1690_vm14 = vmpackc.low %vm1079_vm10, %vm1079_vm10 }
  0xf7   : > { %vm1692_vm15 = vmpackc.low %vm1082_vm11, %vm1082_vm11 }
  0xf8   : > { %1790 = vmatpush3.bf16.msra.mxu1 %v2673_v12  ;;  %vm1696_vm0 = vmpackc.low %vm1084_vm13, %vm1084_vm13 }
  0xf9   : > { %1812 = vmatpush3.bf16.msra.mxu0 %v2677_v53  ;;  %1819 = vmatprep.subr.bf16.mxu1 %v2447_v8 }
  0xfa   : > { %1841 = vmatprep.subr.bf16.mxu0 %v2449_v9 }
  0xfb   : > { %1671 = vmatmul.mubr.msk.bf16.vlgmr.msra.gmra.mrb[4].mxu1 %vm1670_vm4, %v2994_v10 }
  0xfc   : > { %1675 = vmatmul.mubr.msk.bf16.vlgmr.msra.gmra.mrb[8].mxu0 %vm1674_vm6, %v2994_v10  ;;  %1820 = vmatpush3.bf16.msra.mxu1 %v2453_v11  ;;  %vm1698_vm6 = vmpackc.low %vm1083_vm2, %vm1083_vm2 }
  0xfd   : > { %1842 = vmatpush3.bf16.msra.mxu0 %v2455_v13  ;;  %1821 = vmatprep.subr.bf16.mxu1 %v2457_v14 }
  0xfe   : > { %1843 = vmatprep.subr.bf16.mxu0 %v2461_v15  ;;  %1685 = vmatprep.mubr.msk.bf16.mxu1 %vm1684_vm7, %v2994_v10 }
  0xff   : > { %1689 = vmatprep.mubr.msk.bf16.mxu0 %vm1688_vm8, %v2994_v10 }
 0x100   : > { %1822 = vmatpush3.bf16.msra.mxu1 %v2464_v16 }
 0x101   : > { %1844 = vmatpush3.bf16.msra.mxu0 %v2467_v17  ;;  %1823 = vmatprep.subr.bf16.mxu1 %v2469_v18 }
 0x102   : > { %1845 = vmatprep.subr.bf16.mxu0 %v2473_v19 }
 0x104   : > { %1824 = vmatpush3.bf16.msra.mxu1 %v2476_v20 }
 0x105   : > { %1846 = vmatpush3.bf16.msra.mxu0 %v2479_v21  ;;  %1825 = vmatprep.subr.bf16.mxu1 %v2481_v22 }
 0x106   : > { %1847 = vmatprep.subr.bf16.mxu0 %v2485_v23 }
 0x108   : > { %1826 = vmatpush3.bf16.msra.mxu1 %v2488_v24 }
 0x109   : > { %1848 = vmatpush3.bf16.msra.mxu0 %v2491_v25  ;;  %1827 = vmatprep.subr.bf16.mxu1 %v2493_v26 }
 0x10a   : > { %1849 = vmatprep.subr.bf16.mxu0 %v2497_v27 }
 0x10c   : > { %1828 = vmatpush3.bf16.msra.mxu1 %v2500_v28 }
 0x10d   : > { %1850 = vmatpush3.bf16.msra.mxu0 %v2503_v29  ;;  %1829 = vmatprep.subr.bf16.mxu1 %v2505_v30 }
 0x10e   : > { %1851 = vmatprep.subr.bf16.mxu0 %v2509_v31 }
 0x110   : > { %1830 = vmatpush3.bf16.msra.mxu1 %v2512_v32 }
 0x111   : > { %1852 = vmatpush3.bf16.msra.mxu0 %v2515_v33  ;;  %1831 = vmatprep.subr.bf16.mxu1 %v2517_v34 }
 0x112   : > { %1853 = vmatprep.subr.bf16.mxu0 %v2521_v35 }
 0x114   : > { %1832 = vmatpush3.bf16.msra.mxu1 %v2524_v36 }
 0x115   : > { %1854 = vmatpush3.bf16.msra.mxu0 %v2527_v37  ;;  %1833 = vmatprep.subr.bf16.mxu1 %v2529_v38 }
 0x116   : > { %1855 = vmatprep.subr.bf16.mxu0 %v2533_v39 }
 0x118   : > { %1834 = vmatpush3.bf16.msra.mxu1 %v2536_v40 }
 0x119   : > { %1856 = vmatpush3.bf16.msra.mxu0 %v2539_v41  ;;  %1863 = vmatprep.subr.bf16.mxu1 %v2541_v42 }
 0x11a   : > { %1885 = vmatprep.subr.bf16.mxu0 %v2545_v43 }
 0x11b   : > { %1687 = vmatmul.mubr.msk.bf16.vlgmr.msra.gmra.mrb[8].mxu1 %vm1686_vm12, %v2994_v10 }
 0x11c   : > { %1691 = vmatmul.mubr.msk.bf16.vlgmr.msra.gmra.mrb[12].mxu0 %vm1690_vm14, %v2994_v10  ;;  %1864 = vmatpush3.bf16.msra.mxu1 %v2576_v52 }
 0x11d   : > { %1693 = vmatprep.mubr.msk.bf16.mxu1 %vm1692_vm15, %v2994_v10  ;;  %1886 = vmatpush3.bf16.msra.mxu0 %v2579_v54 }
 0x11e   : > { %1697 = vmatprep.mubr.msk.bf16.mxu0 %vm1696_vm0, %v2994_v10  ;;  %1865 = vmatprep.subr.bf16.mxu1 %v2586_v55 }
 0x11f   : > { %1887 = vmatprep.subr.bf16.mxu0 %v2589_v56  ;;  %v2996_v56 = vld [vmem:[#allocation22_spill] sm:$0xff] }
 0x120   : > { %1866 = vmatpush3.bf16.msra.mxu1 %v2593_v57  ;;  %v2997_v57 = vld [vmem:[#allocation23_spill] sm:$0xff] }
 0x121   : > { %1888 = vmatpush3.bf16.msra.mxu0 %v2597_v58  ;;  %1867 = vmatprep.subr.bf16.mxu1 %v2599_v59  ;;  %v2998_v58 = vld [vmem:[#allocation24_spill] sm:$0xff]  ;;  %v2999_v59 = vld [vmem:[#allocation25_spill] sm:$0xff] }
 0x122   : > { %1889 = vmatprep.subr.bf16.mxu0 %v2603_v60  ;;  %v3000_v60 = vld [vmem:[#allocation26_spill] sm:$0xff] }
 0x124   : > { %1868 = vmatpush3.bf16.msra.mxu1 %v2607_v61  ;;  %v3001_v61 = vld [vmem:[#allocation27_spill] sm:$0xff] }
 0x125   : > { %1890 = vmatpush3.bf16.msra.mxu0 %v2611_v62  ;;  %1869 = vmatprep.subr.bf16.mxu1 %v2613_v63  ;;  %v3003_v63 = vld [vmem:[#allocation28_spill] sm:$0xff] }
 0x126   : > { %1891 = vmatprep.subr.bf16.mxu0 %v2616_v0 }
 0x128   : > { %1870 = vmatpush3.bf16.msra.mxu1 %v2619_v1  ;;  %v3004_v1 = vld [vmem:[#allocation29_spill] sm:$0xff] }
 0x129   : > { %1892 = vmatpush3.bf16.msra.mxu0 %v2995_v50  ;;  %1871 = vmatprep.subr.bf16.mxu1 %v2996_v56  ;;  %v3005_v50 = vld [vmem:[#allocation30_spill] sm:$0xff] }
 0x12a   : > { %1893 = vmatprep.subr.bf16.mxu0 %v2997_v57 }
 0x12b   : > { %v2762_v62 = vpop.f32.mrb[0].mxu0 }
 0x12c   : > { %1872 = vmatpush3.bf16.msra.mxu1 %v2998_v58  ;;  %3002 = vst [vmem:[#allocation22_spill] sm:$0xff] %v2762_v62  ;;  %v2001_v0 = vpop.f32.mrb[1].mxu0  ;;  %v3006_v62 = vld [vmem:[#allocation31_spill] sm:$0xff] }
 0x12d   : > { %1894 = vmatpush3.bf16.msra.mxu0 %v2999_v59  ;;  %1873 = vmatprep.subr.bf16.mxu1 %v3000_v60  ;;  %v2771_v60 = vpop.permute.xlu1 %1271  ;;  %vm1081_vm1 = vcmp.eq.s32.totalorder %v3006_v62, %v2679_v44 }
 0x12e   : > { %1895 = vmatprep.subr.bf16.mxu0 %v3001_v61  ;;  %vm1274_vm3 = vcmp.eq.s32.totalorder %v2552_v46, %v2771_v60  ;;  %vm1694_vm4 = vmpackc.low %vm1081_vm1, %vm1081_vm1  ;;  %vm1276_vm5 = vcmp.eq.s32.totalorder %v2555_v47, %v2771_v60  ;;  %vm1273_vm9 = vcmp.eq.s32.totalorder %v2549_v45, %v2771_v60  ;;  %vm1275_vm10 = vcmp.eq.s32.totalorder %v2558_v48, %v2771_v60 }
 0x12f   : > { %vm1708_vm7 = vmpackc.low %vm1274_vm3, %vm1274_vm3  ;;  %vm1278_vm11 = vcmp.eq.s32.totalorder %v2561_v49, %v2771_v60  ;;  %vm1280_vm13 = vcmp.eq.s32.totalorder %v2566_v51, %v2771_v60  ;;  %vm1277_vm1 = vcmp.eq.s32.totalorder %v3006_v62, %v2771_v60  ;;  %vm1279_vm2 = vcmp.eq.s32.totalorder %v2670_v2, %v2771_v60 }
 0x130   : > { %1874 = vmatpush3.bf16.msra.mxu1 %v3003_v63  ;;  %vm1712_vm8 = vmpackc.low %vm1276_vm5, %vm1276_vm5 }
 0x131   : > { %1896 = vmatpush3.bf16.msra.mxu0 %v3004_v1  ;;  %1875 = vmatprep.subr.bf16.mxu1 %v3005_v50  ;;  %vm1710_vm12 = vmpackc.low %vm1273_vm9, %vm1273_vm9 }
 0x132   : > { %1897 = vmatprep.subr.bf16.mxu0 %v2652_v3  ;;  %vm1714_vm14 = vmpackc.low %vm1275_vm10, %vm1275_vm10 }
 0x133   : > { %vm1716_vm15 = vmpackc.low %vm1278_vm11, %vm1278_vm11  ;;  %v3019_v46 = vld [vmem:[#allocation22_spill] sm:$0xff] }
 0x134   : > { %1876 = vmatpush3.bf16.msra.mxu1 %v2655_v4  ;;  %vm1720_vm0 = vmpackc.low %vm1280_vm13, %vm1280_vm13 }
 0x135   : > { %1898 = vmatpush3.bf16.msra.mxu0 %v2659_v5  ;;  %1877 = vmatprep.subr.bf16.mxu1 %v2661_v6  ;;  %vm1718_vm3 = vmpackc.low %vm1277_vm1, %vm1277_vm1 }
 0x136   : > { %1899 = vmatprep.subr.bf16.mxu0 %v2664_v7 }
 0x138   : > { %1878 = vmatpush3.bf16.msra.mxu1 %v2673_v12 }
 0x139   : > { %1900 = vmatpush3.bf16.msra.mxu0 %v2677_v53  ;;  %1907 = vmatprep.subr.bf16.mxu1 %v2447_v8  ;;  %v3007_v8 = vld [vmem:[#allocation11_spill] sm:$0xff] }
 0x13a   : > { %1929 = vmatprep.subr.bf16.mxu0 %v2449_v9  ;;  %v3008_v9 = vld [vmem:[#allocation12_spill] sm:$0xff] }
 0x13b   : > { %1695 = vmatmul.mubr.msk.bf16.vlgmr.msra.gmra.mrb[12].mxu1 %vm1694_vm4, %v2994_v10  ;;  %vm1722_vm4 = vmpackc.low %vm1279_vm2, %vm1279_vm2 }
 0x13c   : > { %1699 = vmatmul.mubr.msk.bf16.vlgmr.msra.gmra.mrb[16].mxu0 %vm1698_vm6, %v2994_v10  ;;  %1908 = vmatpush3.bf16.msra.mxu1 %v2453_v11  ;;  %v3009_v11 = vld [vmem:[#allocation13_spill] sm:$0xff] }
 0x13d   : > { %1930 = vmatpush3.bf16.msra.mxu0 %v2455_v13  ;;  %1909 = vmatprep.subr.bf16.mxu1 %v2457_v14  ;;  %v3010_v13 = vld [vmem:[#allocation14_spill] sm:$0xff]  ;;  %v3011_v14 = vld [vmem:[#allocation15_spill] sm:$0xff] }
 0x13e   : > { %1931 = vmatprep.subr.bf16.mxu0 %v2461_v15  ;;  %1709 = vmatprep.mubr.msk.bf16.mxu1 %vm1708_vm7, %v2994_v10  ;;  %v3012_v15 = vld [vmem:[#allocation16_spill] sm:$0xff] }
 0x13f   : > { %1713 = vmatprep.mubr.msk.bf16.mxu0 %vm1712_vm8, %v2994_v10 }
 0x140   : > { %1910 = vmatpush3.bf16.msra.mxu1 %v2464_v16  ;;  %v3013_v16 = vld [vmem:[#allocation17_spill] sm:$0xff] }
 0x141   : > { %1932 = vmatpush3.bf16.msra.mxu0 %v2467_v17  ;;  %1911 = vmatprep.subr.bf16.mxu1 %v2469_v18  ;;  %v3014_v17 = vld [vmem:[#allocation18_spill] sm:$0xff]  ;;  %v3015_v18 = vld [vmem:[#allocation19_spill] sm:$0xff] }
 0x142   : > { %1933 = vmatprep.subr.bf16.mxu0 %v2473_v19  ;;  %v3016_v19 = vld [vmem:[#allocation20_spill] sm:$0xff] }
 0x144   : > { %1912 = vmatpush3.bf16.msra.mxu1 %v2476_v20  ;;  %v3017_v20 = vld [vmem:[#allocation21_spill] sm:$0xff] }
 0x145   : > { %1934 = vmatpush3.bf16.msra.mxu0 %v2479_v21  ;;  %1913 = vmatprep.subr.bf16.mxu1 %v2481_v22  ;;  %v3018_v21 = vld [vmem:[#allocation26_spill] sm:$0xff] }
 0x146   : > { %1935 = vmatprep.subr.bf16.mxu0 %v2485_v23 }
 0x148   : > { %1914 = vmatpush3.bf16.msra.mxu1 %v2488_v24 }
 0x149   : > { %1936 = vmatpush3.bf16.msra.mxu0 %v2491_v25  ;;  %1915 = vmatprep.subr.bf16.mxu1 %v2493_v26 }
 0x14a   : > { %1937 = vmatprep.subr.bf16.mxu0 %v2497_v27 }
 0x14c   : > { %1916 = vmatpush3.bf16.msra.mxu1 %v2500_v28 }
 0x14d   : > { %1938 = vmatpush3.bf16.msra.mxu0 %v2503_v29  ;;  %1917 = vmatprep.subr.bf16.mxu1 %v2505_v30 }
 0x14e   : > { %1939 = vmatprep.subr.bf16.mxu0 %v2509_v31 }
 0x150   : > { %1918 = vmatpush3.bf16.msra.mxu1 %v2512_v32 }
 0x151   : > { %1940 = vmatpush3.bf16.msra.mxu0 %v2515_v33  ;;  %1919 = vmatprep.subr.bf16.mxu1 %v2517_v34 }
 0x152   : > { %1941 = vmatprep.subr.bf16.mxu0 %v2521_v35 }
 0x154   : > { %1920 = vmatpush3.bf16.msra.mxu1 %v2524_v36 }
 0x155   : > { %1942 = vmatpush3.bf16.msra.mxu0 %v2527_v37  ;;  %1921 = vmatprep.subr.bf16.mxu1 %v2529_v38 }
 0x156   : > { %1943 = vmatprep.subr.bf16.mxu0 %v2533_v39  ;;  %v1585_v39 = vld [vmem:[%s2925_s4] ss:$0 sm:$0xff] }
 0x157   : > { %v354_v47 = vadd.f32 %v1585_v39, %v3019_v46 }
 0x158   : > { %1922 = vmatpush3.bf16.msra.mxu1 %v2536_v40 }
 0x159   : > { %1944 = vmatpush3.bf16.msra.mxu0 %v2539_v41  ;;  %1951 = vmatprep.subr.bf16.mxu1 %v2541_v42 }
 0x15a   : > { %1973 = vmatprep.subr.bf16.mxu0 %v2545_v43 }
 0x15b   : > { %1711 = vmatmul.mubr.msk.bf16.vlgmr.msra.gmra.mrb[16].mxu1 %vm1710_vm12, %v2994_v10 }
 0x15c   : > { %1715 = vmatmul.mubr.msk.bf16.vlgmr.msra.gmra.mrb[20].mxu0 %vm1714_vm14, %v2994_v10  ;;  %1952 = vmatpush3.bf16.msra.mxu1 %v2576_v52 }
 0x15d   : > { %1717 = vmatprep.mubr.msk.bf16.mxu1 %vm1716_vm15, %v2994_v10  ;;  %1974 = vmatpush3.bf16.msra.mxu0 %v2579_v54 }
 0x15e   : > { %1721 = vmatprep.mubr.msk.bf16.mxu0 %vm1720_vm0, %v2994_v10  ;;  %1953 = vmatprep.subr.bf16.mxu1 %v2586_v55 }
 0x15f   : > { %1975 = vmatprep.subr.bf16.mxu0 %v3007_v8 }
 0x160   : > { %1954 = vmatpush3.bf16.msra.mxu1 %v3008_v9 }
 0x161   : > { %1976 = vmatpush3.bf16.msra.mxu0 %v3009_v11  ;;  %1955 = vmatprep.subr.bf16.mxu1 %v3010_v13 }
 0x162   : > { %1977 = vmatprep.subr.bf16.mxu0 %v3011_v14 }
 0x164   : > { %1956 = vmatpush3.bf16.msra.mxu1 %v3012_v15 }
 0x165   : > { %1978 = vmatpush3.bf16.msra.mxu0 %v3013_v16  ;;  %1957 = vmatprep.subr.bf16.mxu1 %v3014_v17 }
 0x166   : > { %1979 = vmatprep.subr.bf16.mxu0 %v3015_v18 }
 0x168   : > { %1958 = vmatpush3.bf16.msra.mxu1 %v3016_v19 }
 0x169   : > { %1980 = vmatpush3.bf16.msra.mxu0 %v3017_v20  ;;  %1959 = vmatprep.subr.bf16.mxu1 %v2996_v56 }
 0x16a   : > { %1981 = vmatprep.subr.bf16.mxu0 %v2997_v57 }
 0x16c   : > { %1960 = vmatpush3.bf16.msra.mxu1 %v2998_v58 }
 0x16d   : > { %1982 = vmatpush3.bf16.msra.mxu0 %v2999_v59  ;;  %1961 = vmatprep.subr.bf16.mxu1 %v3018_v21 }
 0x16e   : > { %1983 = vmatprep.subr.bf16.mxu0 %v3001_v61 }
 0x170   : > { %1962 = vmatpush3.bf16.msra.mxu1 %v3003_v63 }
 0x171   : > { %1984 = vmatpush3.bf16.msra.mxu0 %v3004_v1  ;;  %1963 = vmatprep.subr.bf16.mxu1 %v3005_v50 }
 0x172   : > { %1985 = vmatprep.subr.bf16.mxu0 %v2652_v3 }
 0x174   : > { %1964 = vmatpush3.bf16.msra.mxu1 %v2655_v4 }
 0x175   : > { %1986 = vmatpush3.bf16.msra.mxu0 %v2659_v5  ;;  %1965 = vmatprep.subr.bf16.mxu1 %v2661_v6 }
 0x176   : > { %1987 = vmatprep.subr.bf16.mxu0 %v2664_v7 }
 0x178   : > { %1966 = vmatpush3.bf16.msra.mxu1 %v2673_v12 }
 0x179   : > { %1988 = vmatpush3.bf16.msra.mxu0 %v2677_v53 }
 0x17b   : > { %1719 = vmatmul.mubr.msk.bf16.vlgmr.msra.gmra.mrb[20].mxu1 %vm1718_vm3, %v2994_v10 }
 0x17c   : > { %1723 = vmatmul.mubr.msk.bf16.vlgmr.msra.gmra.mrb[24].mxu0 %vm1722_vm4, %v2994_v10 }
 0x1ae   : > { %v1747_v22 = vpop.f32.mrb[0].mxu1 }
 0x1af   : > { %v1769_v23 = vpop.f32.mrb[4].mxu0  ;;  %v1748_v24 = vpop.f32.mrb[1].mxu1 }
 0x1b0   : > { %v1749_v25 = vadd.f32 %v1748_v24, %v1747_v22  ;;  %v1770_v26 = vpop.f32.mrb[5].mxu0  ;;  %v1750_v27 = vpop.f32.mrb[2].mxu1 }
 0x1b1   : > { %v1771_v28 = vadd.f32 %v1770_v26, %v1769_v23  ;;  %v1772_v29 = vpop.f32.mrb[6].mxu0  ;;  %v1751_v30 = vpop.f32.mrb[3].mxu1 }
 0x1b2   : > { %v1773_v31 = vpop.f32.mrb[7].mxu0 }
 0x1b3   : > { %v988_v32 = vadd.f32 %v1771_v28, %v1749_v25 }
 0x1ce   : > { %v1791_v33 = vpop.f32.mrb[4].mxu1 }
 0x1cf   : > { %v1813_v34 = vpop.f32.mrb[8].mxu0  ;;  %v1792_v35 = vpop.f32.mrb[5].mxu1 }
 0x1d0   : > { %v1793_v36 = vadd.f32 %v1792_v35, %v1791_v33  ;;  %v1814_v37 = vpop.f32.mrb[9].mxu0  ;;  %v1794_v38 = vpop.f32.mrb[6].mxu1 }
 0x1d1   : > { %v1815_v40 = vadd.f32 %v1814_v37, %v1813_v34  ;;  %v1816_v41 = vpop.f32.mrb[10].mxu0  ;;  %v1795_v42 = vpop.f32.mrb[7].mxu1 }
 0x1d2   : > { %v1028_v43 = vadd.f32 %v1793_v36, %v988_v32  ;;  %v1817_v45 = vpop.f32.mrb[11].mxu0 }
 0x1d4   : > { %v1068_v48 = vadd.f32 %v1815_v40, %v1028_v43 }
 0x1d6   : > { %v1073_v49 = vadd.f32 %v1068_v48, %v354_v47 }
 0x1ee   : > { %v1835_v51 = vpop.f32.mrb[8].mxu1 }
 0x1ef   : > { %v1857_v52 = vpop.f32.mrb[12].mxu0  ;;  %v1836_v53 = vpop.f32.mrb[9].mxu1 }
 0x1f0   : > { %v1837_v54 = vadd.f32 %v1836_v53, %v1835_v51  ;;  %v1858_v55 = vpop.f32.mrb[13].mxu0  ;;  %v1838_v56 = vpop.f32.mrb[10].mxu1 }
 0x1f1   : > { %v1859_v57 = vadd.f32 %v1858_v55, %v1857_v52  ;;  %v1860_v58 = vpop.f32.mrb[14].mxu0  ;;  %v1839_v59 = vpop.f32.mrb[11].mxu1 }
 0x1f2   : > { %v1861_v60 = vpop.f32.mrb[15].mxu0 }
 0x1f3   : > { %v1184_v61 = vadd.f32 %v1859_v57, %v1837_v54 }
 0x20e   : > { %v1879_v62 = vpop.f32.mrb[12].mxu1 }
 0x20f   : > { %v1901_v63 = vpop.f32.mrb[16].mxu0  ;;  %v1880_v0 = vpop.f32.mrb[13].mxu1 }
 0x210   : > { %v1881_v1 = vadd.f32 %v1880_v0, %v1879_v62  ;;  %v1902_v2 = vpop.f32.mrb[17].mxu0  ;;  %v1882_v3 = vpop.f32.mrb[14].mxu1 }
 0x211   : > { %v1903_v4 = vadd.f32 %v1902_v2, %v1901_v63  ;;  %v1904_v5 = vpop.f32.mrb[18].mxu0  ;;  %v1883_v6 = vpop.f32.mrb[15].mxu1 }
 0x212   : > { %v1224_v7 = vadd.f32 %v1881_v1, %v1184_v61  ;;  %v1905_v10 = vpop.f32.mrb[19].mxu0 }
 0x214   : > { %v1264_v12 = vadd.f32 %v1903_v4, %v1224_v7 }
 0x216   : > { %v1269_v44 = vadd.f32 %v1264_v12, %v1073_v49 }
 0x22e   : > { %v1923_v50 = vpop.f32.mrb[16].mxu1 }
 0x22f   : > { %v1945_v8 = vpop.f32.mrb[20].mxu0  ;;  %v1924_v9 = vpop.f32.mrb[17].mxu1 }
 0x230   : > { %v1925_v11 = vadd.f32 %v1924_v9, %v1923_v50  ;;  %v1946_v13 = vpop.f32.mrb[21].mxu0  ;;  %v1926_v14 = vpop.f32.mrb[18].mxu1 }
 0x231   : > { %v1947_v15 = vadd.f32 %v1946_v13, %v1945_v8  ;;  %v1948_v16 = vpop.f32.mrb[22].mxu0  ;;  %v1927_v17 = vpop.f32.mrb[19].mxu1 }
 0x232   : > { %v1949_v18 = vpop.f32.mrb[23].mxu0 }
 0x233   : > { %v1380_v19 = vadd.f32 %v1947_v15, %v1925_v11 }
 0x24e   : > { %v1967_v20 = vpop.f32.mrb[20].mxu1 }
 0x24f   : > { %v1989_v21 = vpop.f32.mrb[24].mxu0  ;;  %v1968_v22 = vpop.f32.mrb[21].mxu1 }
 0x250   : > { %v1969_v23 = vadd.f32 %v1968_v22, %v1967_v20  ;;  %v1990_v24 = vpop.f32.mrb[25].mxu0  ;;  %v1970_v25 = vpop.f32.mrb[22].mxu1 }
 0x251   : > { %v1991_v26 = vadd.f32 %v1990_v24, %v1989_v21  ;;  %v1992_v27 = vpop.f32.mrb[26].mxu0  ;;  %v1971_v28 = vpop.f32.mrb[23].mxu1 }
 0x252   : > { %v1420_v29 = vadd.f32 %v1969_v23, %v1380_v19  ;;  %v1993_v30 = vpop.f32.mrb[27].mxu0 }
 0x254   : > { %v1460_v31 = vadd.f32 %v1991_v26, %v1420_v29 }
 0x256   : > { %v1465_v32 = vadd.f32 %v1460_v31, %v1269_v44 }
 0x258   : > { %1466 = vst [vmem:[%s258_s25] sm:$0xff] %v1465_v32 }
 0x259   : > { %2215 = shalt.err (!%p2212_p11)
}
 0x25a   : > { %s2216_s13 = scalar_lea.hbm %s2879_s8, 128  ;;  %s2220_s16 = scalar_lea.hbm %s2926_s5, 256 }
 0x25b   : > { %p2217_p13 = scmp.ne.s32.totalorder %s2879_s8, %s2216_s13  ;;  %p2221_p6 = scmp.lt.u32.totalorder %s2879_s8, %s2926_s5 }
 0x25c   : > { %p2222_p9 = scmp.lt.u32.totalorder %s2220_s16, %s2216_s13  ;;  %p2224_p12 = scmp.lt.u32.totalorder %s2216_s13, %s2879_s8 }
 0x25d   : > { %p2218_p0 = pnand %p2217_p13, %p3020_p1 }
 0x25e   : > { %p2223_p10 = por %p2222_p9, %p2221_p6 }
 0x25f   : > { %p2219_p5 = pneg %p2218_p0 }
 0x260   : > { %p2225_p2 = por %p2224_p12, %p2223_p10 }
 0x262   : > { %p2226_p3 = pnand %p2225_p2, %p2219_p5 }
 0x264   : > { %2229 = shalt.err (!%p2226_p3)
}
 0x265   : > { %2014 = dma.vmem_to_hbm [thread:$0]  (%p3020_p1), %s2881_s26, 128, %s2879_s8, %s1468_s10  }
 0x266 PF: > { %p2031_p4 = scmp.ge.s32.totalorder %s2272_s21, 2  ;;  %s1493_s23 = sand.u32 1, %s2260_s18  }
 0x267   : > { %p3021_p7 = scmp.ne.s32.totalorder %s2965_s29, 0  ;;  %s1494_s25 = scalar_lea.sflag [#allocation4], %s1493_s23 }
 0x269   : > { %p2024_p8 = pnand %p2031_p4, %p3021_p7 }
 0x26b   : > { %2255 = dma.done.wait (!%p2024_p8), %s1494_s25, 128  }
 0x26c   : > { %2257 = vsyncadd (!%p2024_p8), %s1494_s25, 4294967168  ;;  %p17_p11 = scmp.ge.s32.totalorder %s2344_s24, 4   ;;  %s3022_s18 = smov %s2264_s19 }
 0x26d   : > { %s3023_s19 = smov %s2268_s20  ;;  %s3024_s20 = smov %s2355_s27 }
 0x26e   : > { %s3025_s21 = smov %s2344_s24  ;;  %19 = sbr.rel (!%p17_p11) target bundleno = 5 (0x5), region = 87 }
 0x275   :  { %1499 = vsyncpa [#allocation3], 1 }
 0x276   :  { %1501 = vsyncpa [#allocation3 + $0x1], 1 }
 0x277   :  { %1502 = vsyncpa [#allocation6], 1 }
 0x278   :  { %1503 = vsyncpa [#allocation4], 1 }
 0x279   :  { %1505 = vsyncpa [#allocation4 + $0x1], 1 }

</bundles_post_ra>
